<compile_context>
chip_gen: v7x
topology: tpu7x:2x2x1
jax: 0.10.0
libtpu: 0.0.40
codegen_flags: <defaults>
</compile_context>

<pallas_src>
import functools

import jax
import jax.numpy as jnp
from jax.experimental import pallas as pl
from jax.experimental.pallas import tpu as pltpu


def _ce_acc_kernel(logits_ref, targets_ref, part_ref, *, n_rows, ignore_index):
    """One row tile: packed partial sums of CE loss (sublane 0) and correct tokens (sublane 1)."""
    i = pl.program_id(0)
    tr, vocab = logits_ref.shape

    x = logits_ref[...]                                   # (TR, V), input dtype (f32/bf16)
    t = targets_ref[...]                                  # (TR, 1) int32

    # Rows past the true N (ragged last tile) are masked out; padded data may be garbage
    # but never reaches the sums (select, not arithmetic).
    row_ids = i * tr + jax.lax.broadcasted_iota(jnp.int32, (tr, 1), 0)
    row_valid = row_ids < n_rows

    # (1, V) iota broadcast against t -- avoids a (TR, V) int32 intermediate.
    vocab_ids = jax.lax.broadcasted_iota(jnp.int32, (1, vocab), 1)

    # Row max and target logit in the input dtype (compares/selects are exact);
    # exp / sum / log accumulate in f32.
    m = jnp.max(x, axis=-1, keepdims=True)                                  # (TR, 1)
    sum_exp = jnp.sum(jnp.exp((x - m).astype(jnp.float32)),
                      axis=-1, keepdims=True)                               # (TR, 1) f32
    tgt_logit = jnp.sum(jnp.where(vocab_ids == t, x, jnp.zeros((), x.dtype)),
                        axis=-1, keepdims=True)                             # (TR, 1) = x[t]
    lse = m.astype(jnp.float32) + jnp.log(sum_exp)
    per_tok_loss = lse - tgt_logit.astype(jnp.float32)                      # (TR, 1)

    # Token "correct": target logit equals the row max.  Matches torch.argmax == target
    # except when the target ties the max at a non-first vocab index (vanishingly rare
    # with float logits).  Range guard keeps ignore_index rows from ever matching.
    t_in_range = jnp.logical_and(t >= 0, t < vocab)
    correct = jnp.logical_and(tgt_logit == m, t_in_range).astype(jnp.float32)

    loss_valid = jnp.logical_and(row_valid, t != ignore_index)
    loss_part = jnp.sum(jnp.where(loss_valid, per_tok_loss, 0.0))
    correct_part = jnp.sum(jnp.where(row_valid, correct, 0.0))

    # Single lane-dense (8,128)-aligned output block per tile:
    #   sublane 0 -> loss partial, sublane 1 -> correct-token partial.
    sub = jax.lax.broadcasted_iota(jnp.int32, (1, 8, 128), 1)
    part_ref[...] = (jnp.where(sub == 0, loss_part, 0.0)
                     + jnp.where(sub == 1, correct_part, 0.0))


def _round_up(x, m):
    return ((x + m - 1) // m) * m


def _round_down(x, m):
    return (x // m) * m


def _device_vmem_bytes():
    """Physical VMEM per TensorCore; conservative 64 MiB (v7x) fallback."""
    try:
        info = pltpu.get_tpu_info()
        cap = getattr(info, "vmem_capacity_bytes", None)
        if cap:
            return int(cap)
    except Exception:
        pass
    return 64 * 1024 * 1024


def _bytes_per_row(vocab, itemsize):
    """Per-row VMEM cost: double-buffered input tile + ~3 f32-sized in-kernel
    intermediates (exp output, one-hot select, compare masks)."""
    return 2 * vocab * itemsize + 3 * vocab * 4 + 2 * 4  # + double-buffered int32 target


def _pick_tile_rows(n_rows, vocab, itemsize, vmem_budget):
    """Largest sublane-aligned row tile that (a) fits the VMEM budget including
    intermediates and (b) leaves >= ~4 grid steps for megacore balance."""
    per_row = _bytes_per_row(vocab, itemsize)
    max_rows_vmem = max(8, vmem_budget // per_row)
    max_rows_vmem = min(max_rows_vmem, 2048)
    # Aim for at least 4 grid steps (2 per TensorCore on v7x) when N allows it.
    rows_for_4_tiles = _round_up((n_rows + 3) // 4, 8)
    tile = min(int(max_rows_vmem), max(8, rows_for_4_tiles), max(8, _round_up(n_rows, 8)))
    tile = max(8, _round_down(tile, 8))
    return int(tile)


def ce_and_token_accuracy(outputs, targets, *, ignore_index=-100, vmem_budget=None):
    """Mean cross-entropy loss (ignore_index-aware) and token accuracy in one Pallas pass."""
    B, S, V = outputs.shape
    N = B * S
    logits2d = outputs.reshape(N, V)                       # no host-side padding copy
    tgt2d = targets.reshape(N, 1).astype(jnp.int32)

    itemsize = jnp.dtype(outputs.dtype).itemsize
    device_vmem = _device_vmem_bytes()
    headroom = 8 * 1024 * 1024
    usable_vmem = max(16 * 1024 * 1024, device_vmem - headroom)
    if vmem_budget is None:
        vmem_budget = usable_vmem
    vmem_budget = min(int(vmem_budget), usable_vmem)

    tile_rows = _pick_tile_rows(N, V, itemsize, vmem_budget)
    num_tiles = pl.cdiv(N, tile_rows)

    # Scoped-VMEM limit sized to actual usage (inputs + intermediates + outputs),
    # clamped below the physical VMEM of the device (critical on v7x's 64 MiB).
    est_vmem = (tile_rows * _bytes_per_row(V, itemsize)    # tiles + intermediates
                + 2 * 8 * 128 * 4                          # double-buffered output block
                + 2 * 1024 * 1024)                         # slack
    vmem_limit = int(min(usable_vmem, max(est_vmem, 16 * 1024 * 1024)))

    kernel = functools.partial(_ce_acc_kernel, n_rows=N, ignore_index=ignore_index)

    parts = pl.pallas_call(
        kernel,
        out_shape=jax.ShapeDtypeStruct((num_tiles, 8, 128), jnp.float32),
        grid_spec=pltpu.PrefetchScalarGridSpec(
            num_scalar_prefetch=0,
            grid=(num_tiles,),
            in_specs=[
                pl.BlockSpec((tile_rows, V), lambda i: (i, 0)),
                pl.BlockSpec((tile_rows, 1), lambda i: (i, 0)),
            ],
            out_specs=pl.BlockSpec((1, 8, 128), lambda i: (i, 0, 0)),
        ),
        compiler_params=pltpu.CompilerParams(
            dimension_semantics=("parallel",),             # no carried state -> megacore-friendly
            vmem_limit_bytes=vmem_limit),
    )(logits2d, tgt2d)

    loss_sum = jnp.sum(parts[:, 0, 0])
    correct_sum = jnp.sum(parts[:, 1, 0])

    valid_tokens = jnp.sum((targets.reshape(-1) != ignore_index).astype(jnp.float32))
    base_loss = loss_sum / jnp.maximum(valid_tokens, 1.0)   # CrossEntropyLoss 'mean'
    token_acc = correct_sum / jnp.float32(N)                # torch: mean over ALL tokens
    return base_loss, token_acc


class AtomCountAwareLossPallas:
    """JAX/Pallas equivalent of AtomCountAwareLoss (base_criterion = CrossEntropyLoss)."""

    def __init__(self, validity_weight=0.3, hc_count_weight=0.4, token_weight=0.3,
                 ignore_index=-100):
        total = validity_weight + hc_count_weight + token_weight
        self.validity_weight = validity_weight / total
        self.hc_count_weight = hc_count_weight / total
        self.token_weight = token_weight / total
        self.ignore_index = ignore_index

    def __call__(self, outputs, targets, validity_penalties=None, hc_count_penalties=None):
        base_loss, token_acc = ce_and_token_accuracy(
            outputs, targets, ignore_index=self.ignore_index)
        loss_components = {
            "base_loss": base_loss,
            "validity_penalty": 0.0,
            "hc_count_penalty": 0.0,
            "token_reward": 0.0,
        }

        if validity_penalties is not None and hc_count_penalties is not None:
            avg_validity_penalty = jnp.mean(validity_penalties.astype(jnp.float32))
            avg_hc_count_penalty = jnp.mean(hc_count_penalties.astype(jnp.float32))

            # discrete token reward exactly as in _calculate_token_reward
            token_reward = jnp.where(
                token_acc > 0.9, 1.0,
                jnp.where(token_acc > 0.8, 0.5,
                          jnp.where(token_acc > 0.7, 0.2, 0.0)))

            total_loss = (self.token_weight * base_loss
                          + self.validity_weight * avg_validity_penalty
                          + self.hc_count_weight * avg_hc_count_penalty
                          - 0.1 * token_reward)

            loss_components.update({
                "validity_penalty": avg_validity_penalty,
                "hc_count_penalty": avg_hc_count_penalty,
                "token_reward": token_reward,
                "valid_molecules": jnp.sum((validity_penalties == 0.0).astype(jnp.int32)),
                "perfect_hc_matches": jnp.sum((hc_count_penalties < 0.1).astype(jnp.int32)),
                "validity_rate": 1.0 - avg_validity_penalty / 2.0,
                "hc_match_rate": 1.0 - avg_hc_count_penalty,
            })
            return total_loss, loss_components

        return base_loss, loss_components


if __name__ == "__main__":
    key = jax.random.PRNGKey(0)
    B, S, V = 2, 8, 32  # batch, seq_len, vocab_size  (N = B*S = 16 rows)

    k1, k2, k3, k4 = jax.random.split(key, 4)
    outputs = jax.random.normal(k1, (B, S, V), dtype=jnp.float32)       # model logits
    targets = jax.random.randint(k2, (B, S), 0, V, dtype=jnp.int32)     # target token ids

    # Precomputed per-sample penalties standing in for the RDKit validator output.
    validity_penalties = jax.random.choice(k3, jnp.array([0.0, 1.0, 2.0]), (B,))
    hc_count_penalties = jax.random.uniform(k4, (B,), dtype=jnp.float32)

    loss_fn = AtomCountAwareLossPallas(validity_weight=0.3, hc_count_weight=0.4,
                                       token_weight=0.3)

    total_loss, components = loss_fn(outputs, targets,
                                     validity_penalties=validity_penalties,
                                     hc_count_penalties=hc_count_penalties)
    jax.block_until_ready(total_loss)
    jax.block_until_ready(components["base_loss"])

    # no-predictions path (returns plain base_loss) — also exercised
    base_only, _ = loss_fn(outputs, targets)
    jax.block_until_ready(base_only)

    # lightweight pure-JAX reference check of the fused CE / accuracy kernel
    logits = outputs.reshape(-1, V).astype(jnp.float32)
    tref = targets.reshape(-1)
    lse_ref = jax.scipy.special.logsumexp(logits, axis=-1)
    ce_ref = jnp.mean(lse_ref - logits[jnp.arange(logits.shape[0]), tref])
    acc_ref = jnp.mean((jnp.argmax(logits, axis=-1) == tref).astype(jnp.float32))
    base_k, acc_k = ce_and_token_accuracy(outputs, targets)
    assert jnp.allclose(base_k, ce_ref, rtol=1e-3, atol=1e-3), (base_k, ce_ref)
    assert jnp.allclose(acc_k, acc_ref, rtol=1e-3, atol=1e-3), (acc_k, acc_ref)

    print("KERNEL_OK")
</pallas_src>

<mosaic_0001>
module attributes {stable_mosaic.version = 11 : i64} {
  func.func @_ce_acc_kernel(%arg0: i32, %arg1: memref<8x32xf32, #tpu.memory_space<vmem>>, %arg2: memref<8x1xi32, #tpu.memory_space<vmem>>, %arg3: memref<1x8x128xf32, #tpu.memory_space<vmem>>) attributes {dimension_semantics = [#tpu.dimension_semantics<parallel>], iteration_bounds = array<i64: 2>, scalar_prefetch = 0 : i64, scratch_operands = 0 : i64, tpu.core_type = #tpu.core_type<tc>, window_params = [{transform_indices = @transform_0, window_bounds = array<i64: 8, 32>}, {transform_indices = @transform_1, window_bounds = array<i64: 8, 1>}, {transform_indices = @transform_2, window_bounds = array<i64: 1, 8, 128>}]} {
    %c0 = arith.constant 0 : index
    %c0_0 = arith.constant 0 : index
    %0 = vector.load %arg1[%c0, %c0_0] : memref<8x32xf32, #tpu.memory_space<vmem>>, vector<8x32xf32>
    %c0_1 = arith.constant 0 : index
    %c0_2 = arith.constant 0 : index
    %1 = vector.load %arg2[%c0_1, %c0_2] : memref<8x1xi32, #tpu.memory_space<vmem>>, vector<8x1xi32>
    %c8_i32 = arith.constant 8 : i32
    %2 = arith.muli %arg0, %c8_i32 : i32
    %3 = tpu.iota {dimensions = array<i32: 0>} : vector<8x1xi32>
    %4 = vector.broadcast %2 : i32 to vector<8x1xi32>
    %5 = arith.addi %4, %3 : vector<8x1xi32>
    %c16_i32 = arith.constant 16 : i32
    %6 = vector.broadcast %c16_i32 : i32 to vector<8x1xi32>
    %7 = arith.cmpi slt, %5, %6 : vector<8x1xi32>
    %8 = tpu.iota {dimensions = array<i32: 1>} : vector<1x32xi32>
    %cst = arith.constant dense<0xFF800000> : vector<8xf32>
    %9 = vector.multi_reduction <maximumf>, %0, %cst [1] : vector<8x32xf32> to vector<8xf32>
    %10 = vector.shape_cast %9 : vector<8xf32> to vector<8x1xf32>
    %11 = vector.broadcast %10 : vector<8x1xf32> to vector<8x32xf32>
    %12 = arith.subf %0, %11 : vector<8x32xf32>
    %13 = math.exp %12 : vector<8x32xf32>
    %cst_3 = arith.constant dense<0.000000e+00> : vector<8xf32>
    %14 = vector.multi_reduction <add>, %13, %cst_3 [1] : vector<8x32xf32> to vector<8xf32>
    %15 = vector.shape_cast %14 : vector<8xf32> to vector<8x1xf32>
    %16 = vector.broadcast %8 : vector<1x32xi32> to vector<8x32xi32>
    %17 = vector.broadcast %1 : vector<8x1xi32> to vector<8x32xi32>
    %18 = arith.cmpi eq, %16, %17 : vector<8x32xi32>
    %cst_4 = arith.constant 0.000000e+00 : f32
    %19 = vector.broadcast %cst_4 : f32 to vector<8x32xf32>
    %20 = arith.select %18, %0, %19 : vector<8x32xi1>, vector<8x32xf32>
    %cst_5 = arith.constant dense<0.000000e+00> : vector<8xf32>
    %21 = vector.multi_reduction <add>, %20, %cst_5 [1] : vector<8x32xf32> to vector<8xf32>
    %22 = vector.shape_cast %21 : vector<8xf32> to vector<8x1xf32>
    %23 = math.log %15 : vector<8x1xf32>
    %24 = arith.addf %10, %23 : vector<8x1xf32>
    %25 = arith.subf %24, %22 : vector<8x1xf32>
    %c0_i32 = arith.constant 0 : i32
    %26 = vector.broadcast %c0_i32 : i32 to vector<8x1xi32>
    %27 = arith.cmpi sge, %1, %26 : vector<8x1xi32>
    %c32_i32 = arith.constant 32 : i32
    %28 = vector.broadcast %c32_i32 : i32 to vector<8x1xi32>
    %29 = arith.cmpi slt, %1, %28 : vector<8x1xi32>
    %30 = arith.andi %27, %29 : vector<8x1xi1>
    %31 = arith.cmpf oeq, %22, %10 : vector<8x1xf32>
    %32 = arith.andi %31, %30 : vector<8x1xi1>
    %33 = arith.extui %32 : vector<8x1xi1> to vector<8x1xi32>
    %34 = arith.sitofp %33 : vector<8x1xi32> to vector<8x1xf32>
    %c-100_i32 = arith.constant -100 : i32
    %35 = vector.broadcast %c-100_i32 : i32 to vector<8x1xi32>
    %36 = arith.cmpi ne, %1, %35 : vector<8x1xi32>
    %37 = arith.andi %7, %36 : vector<8x1xi1>
    %cst_6 = arith.constant 0.000000e+00 : f32
    %38 = vector.broadcast %cst_6 : f32 to vector<8x1xf32>
    %39 = arith.select %37, %25, %38 : vector<8x1xi1>, vector<8x1xf32>
    %40 = vector.shape_cast %39 : vector<8x1xf32> to vector<1x8x1xf32>
    %cst_7 = arith.constant dense<0.000000e+00> : vector<1xf32>
    %41 = vector.multi_reduction <add>, %40, %cst_7 [1, 2] : vector<1x8x1xf32> to vector<1xf32>
    %42 = vector.shape_cast %41 : vector<1xf32> to vector<1x1x1xf32>
    %43 = vector.extract %42[0, 0, 0] : f32 from vector<1x1x1xf32>
    %cst_8 = arith.constant 0.000000e+00 : f32
    %44 = vector.broadcast %cst_8 : f32 to vector<8x1xf32>
    %45 = arith.select %7, %34, %44 : vector<8x1xi1>, vector<8x1xf32>
    %46 = vector.shape_cast %45 : vector<8x1xf32> to vector<1x8x1xf32>
    %cst_9 = arith.constant dense<0.000000e+00> : vector<1xf32>
    %47 = vector.multi_reduction <add>, %46, %cst_9 [1, 2] : vector<1x8x1xf32> to vector<1xf32>
    %48 = vector.shape_cast %47 : vector<1xf32> to vector<1x1x1xf32>
    %49 = vector.extract %48[0, 0, 0] : f32 from vector<1x1x1xf32>
    %50 = tpu.iota {dimensions = array<i32: 1>} : vector<1x8x128xi32>
    %c0_i32_10 = arith.constant 0 : i32
    %51 = vector.broadcast %c0_i32_10 : i32 to vector<1x8x128xi32>
    %52 = arith.cmpi eq, %50, %51 : vector<1x8x128xi32>
    %cst_11 = arith.constant 0.000000e+00 : f32
    %53 = vector.broadcast %43 : f32 to vector<1x8x128xf32>
    %54 = vector.broadcast %cst_11 : f32 to vector<1x8x128xf32>
    %55 = arith.select %52, %53, %54 : vector<1x8x128xi1>, vector<1x8x128xf32>
    %c1_i32 = arith.constant 1 : i32
    %56 = vector.broadcast %c1_i32 : i32 to vector<1x8x128xi32>
    %57 = arith.cmpi eq, %50, %56 : vector<1x8x128xi32>
    %cst_12 = arith.constant 0.000000e+00 : f32
    %58 = vector.broadcast %49 : f32 to vector<1x8x128xf32>
    %59 = vector.broadcast %cst_12 : f32 to vector<1x8x128xf32>
    %60 = arith.select %57, %58, %59 : vector<1x8x128xi1>, vector<1x8x128xf32>
    %61 = arith.addf %55, %60 : vector<1x8x128xf32>
    %c0_13 = arith.constant 0 : index
    %c0_14 = arith.constant 0 : index
    %c0_15 = arith.constant 0 : index
    %62 = vector.load %arg3[%c0_13, %c0_14, %c0_15] : memref<1x8x128xf32, #tpu.memory_space<vmem>>, vector<1x8x128xf32>
    tpu.vector_store %arg3[%c0_13, %c0_14, %c0_15], %61 {strides = array<i32>} : memref<1x8x128xf32, #tpu.memory_space<vmem>>, vector<1x8x128xf32>,
    return
  }
  func.func @transform_0(%arg0: i32) -> (i32, i32) {
    %c0_i32 = arith.constant 0 : i32
    %c0_i32_0 = arith.constant 0 : i32
    return %arg0, %c0_i32 : i32, i32
  }
  func.func @transform_1(%arg0: i32) -> (i32, i32) {
    %c0_i32 = arith.constant 0 : i32
    %c0_i32_0 = arith.constant 0 : i32
    return %arg0, %c0_i32 : i32, i32
  }
  func.func @transform_2(%arg0: i32) -> (i32, i32, i32) {
    %c0_i32 = arith.constant 0 : i32
    %c0_i32_0 = arith.constant 0 : i32
    %c0_i32_1 = arith.constant 0 : i32
    return %arg0, %c0_i32, %c0_i32_0 : i32, i32, i32
  }
}

</mosaic_0001>

<bundles_post_ra>
// kernel: tpu_custom_call.1
= control target key start
LH: loop header
LB: loop body
LE: loop exit
PB: predicated region body
PF: predicated region fallthrough
CT: control target
= control target key end

     0   :  { %7 = vsyncpa [#allocation3], 0  ;;  %s565_s0 = inlined_call_operand.vmem [shape: f32[16,32], index: 0, kind: input, shape index: {}]   ;;  %s566_s1 = inlined_call_operand.vmem [shape: s32[16,1], index: 1, kind: input, shape index: {}]   ;;  %s567_s2 = inlined_call_operand.hbm [shape: f32[2,8,128], index: 2, kind: output, shape index: {}]  }
   0x1   :  { %9 = vsyncpa [#allocation3 + $0x1], 0  ;;  %s458_s9 = smov 0   ;;  %s460_s10 = smov 0  }
   0x2   :  { %s462_s11 = smov 0   ;;  %s464_s12 = smov 0  }
   0x3 LB: > { %s479_s13 = sadd.s32 4294967295, %s438_s12   ;;  %s313_s14 = sadd.s32 4294967294, %s438_s12   ;;  %s438_s12 = sphi %s464_s12, %s573_s12   ;;  %s434_s11 = sphi %s462_s11, %s572_s11   ;;  %s430_s10 = sphi %s460_s10, %s571_s10   ;;  %s426_s9 = sphi %s458_s9, %s570_s9  }
   0x4   : > { %s483_s15 = sadd.s32 1, %s438_s12   ;;  %s74_s16 = sadd.s32 1, %s434_s11 }
   0x5   : > { %s71_s17 = ssub.s32 %s438_s12, %s483_s15  ;;  %p84_p0 = scmp.ne.s32.totalorder %s434_s11, %s430_s10 }
   0x6   : > { %p72_p1 = scmp.eq.s32.totalorder %s71_s17, 0  ;;  %p85_p2 = scmp.eq.s32.totalorder %s479_s13, 1 }
   0x7   : > { %p90_p3 = scmp.ne.s32.totalorder %s430_s10, %s426_s9  ;;  %p91_p4 = scmp.eq.s32.totalorder %s313_s14, 1 }
   0x8   : > { %s494_s18 = scalar_select %p72_p1, %s434_s11, %s74_s16  }
   0x9   : > { %p496_p5 = por %p85_p2, %p84_p0  ;;  %p500_p6 = por %p91_p4, %p90_p3 }
   0xa   : > { %p316_p7 = scmp.ge.s32.totalorder %s438_s12, 1  ;;  %p123_p8 = scmp.lt.s32.totalorder %s438_s12, 3 }
   0xc   : > { %p124_p9 = pnand %p316_p7, %p123_p8 }
   0xd   : > { %p148_p10 = scmp.lt.s32.totalorder (!%p124_p9), %s479_s13, 1  ;;  %v440_v0 = vmov (!%p124_p9), 0   ;;  %vm166_vm0 = vcmask (!%p124_p9), 261120   ;;  %v159_v7 = vlaneseq (!%p124_p9)  ;;  %s320_s29 = sshll.u32 (!%p124_p9), %s479_s13, 3  ;;  %v441_v23 = vmov (!%p124_p9), 0.0  }
   0xe   : > { %127 = sbr.rel (%p124_p9) target bundleno = 572 (0x23c), region = 28  ;;  %371 = vset.pattern.permute.xlu0 (!%p124_p9), %v440_v0  ;;  %v161_v16 = vstv (!%p124_p9), %s320_s29  ;;  %vm198_vm10 = vcmask (!%p124_p9), 7168   ;;  %s145_s30 = sand.u32 (!%p124_p9), 1, %s430_s10  }
   0xf   : > { %v165_v8 = vand.u32 (!%p124_p9), 127, %v159_v7  ;;  %v160_v15 = vshrl.u32 (!%p124_p9), %v159_v7, 7  ;;  %s317_s3 = sshll.u32 (!%p124_p9), %s145_s30, 3  ;;  %s323_s5 = sshll.u32 (!%p124_p9), %s479_s13, 7 }
  0x10   : > { %s147_s7 = scalar_lea.vmem (!%p124_p9), [#allocation2], %s317_s3  ;;  %s523_s17 = scalar_lea.hbm (!%p124_p9), %s567_s2, %s323_s5 }
  0x11   : > { %v162_v18 = vadd.s32 (!%p124_p9), %v161_v16, %v160_v15  ;;  %vm220_vm11 = vcmp.eq.s32.totalorder (!%p124_p9), %v160_v15, 0  ;;  %vm223_vm12 = vcmp.eq.s32.totalorder (!%p124_p9), %v160_v15, 1  ;;  %s242_s8 = sshll.u32 (!%p124_p9), %s147_s7, 4  ;;  %s525_s8 = int_to_ptr.vmem [resolvable:$true] %s242_s8 }
  0x13   : > { %vm163_vm8 = vcmp.lt.s32.totalorder (!%p124_p9), %v162_v18, 16 }
  0x15   : > { %s149_s21 = scalar_select %p148_p10, %s479_s13, 1 }
  0x16   : > { %s376_s13 = scalar_lea.vmem %s525_s8, 128 }
  0x17   : > { %s318_s22 = sshll.u32 %s149_s21, 3  ;;  %s229_s21 = scalar_lea.sflag [#allocation3], %s145_s30 }
  0x18   : > { %s151_s25 = scalar_lea.vmem %s565_s0, %s318_s22  ;;  %s155_s28 = scalar_lea.vmem %s566_s1, %s318_s22 }
  0x19   : > { %v156_v1 = vld [vmem:[%s151_s25] sm:$0xff]  ;;  %p377_p11 = scmp.ne.s32.totalorder %s525_s8, %s376_s13  ;;  %s442_s22 = smov [#allocation2]  }
  0x1a   : > { %v167_v2 = vsel %vm166_vm0, %v156_v1, -inf  ;;  %v157_v3 = vld [vmem:[%s155_s28] sm:$0xff]  ;;  %s380_s23 = sshll.u32 %s442_s22, 4  ;;  %s381_s23 = int_to_ptr.vmem [resolvable:$false] %s380_s23 }
  0x1b   : > { %168 = vmax.xlane.f32.xlu0 %v167_v2  ;;  %vm188_vm2 = vcmp.ge.s32.totalorder %v157_v3, 0  ;;  %vm189_vm3 = vcmp.lt.s32.totalorder %v157_v3, 32  ;;  %vm195_vm6 = vcmp.ne.s32.totalorder %v157_v3, 4294967196  ;;  %p378_p12 = pnand %p377_p11, %p496_p5  ;;  %s382_s24 = scalar_lea.vmem %s381_s23, 256 }
  0x1c   : > { %vm190_vm4 = vmand %vm188_vm2, %vm189_vm3  ;;  %p383_p0 = scmp.lt.s32.totalorder %s525_s8, %s381_s23  ;;  %p384_p1 = scmp.lt.s32.totalorder %s382_s24, %s376_s13 }
  0x1d   : > { %vm196_vm9 = vmand %vm163_vm8, %vm195_vm6  ;;  %p379_p13 = pneg %p378_p12 }
  0x1e   : > { %p385_p2 = por %p384_p1, %p383_p0 }
  0x20   : > { %p386_p3 = pnand %p385_p2, %p379_p13 }
  0x31   : > { %177 = vperm.xlu0 %371, %v157_v3  }
  0xa8   : > { %v169_v4 = vpop.xlane.xlu0 %168 }
  0xa9   : > { %v170_v5 = vsub.f32 %v156_v1, %v169_v4 }
  0xab   : > { %v171_v6 = vmul.f32 1.442695, %v170_v5 }
  0xad   : > { %372 = vpow2.f32 %v171_v6 }
  0xb0   : > { %v178_v9 = vpop.permute.xlu0 %177 }
  0xb1   : > { %vm179_vm1 = vcmp.eq.s32.totalorder %v165_v8, %v178_v9 }
  0xb2   : > { %v180_v11 = vsel %vm179_vm1, %v156_v1, 0.0 }
  0xb3   : > { %v181_v13 = vsel %vm166_vm0, %v180_v11, 0.0 }
  0xb7   : > { %v373_v10 = vpop.eup %372 }
  0xb8   : > { %v173_v12 = vsel %vm166_vm0, %v373_v10, 0.0 }
  0xb9   : > { %174 = vadd.xlane.f32.xlu1 %v173_v12 }
  0xbd   : > { %182 = vadd.xlane.f32.xlu1 %v181_v13 }
 0x146   : > { %v175_v14 = vpop.xlane.xlu1 %174 }
 0x147   : > { %374 = vlog2.f32 %v175_v14 }
 0x14a   : > { %v183_v17 = vpop.xlane.xlu1 %182 }
 0x14b   : > { %vm191_vm5 = vcmp.eq.f32.partialorder %v183_v17, %v169_v4 }
 0x14c   : > { %vm192_vm7 = vmand %vm191_vm5, %vm190_vm4 }
 0x14d   : > { %v321_v24 = vsel %vm192_vm7, 1.0, %v441_v23 }
 0x14e   : > { %v209_v27 = vsel %vm163_vm8, %v321_v24, 0.0 }
 0x14f   : > { %v210_v28 = vsel %vm198_vm10, %v209_v27, 0.0 }
 0x151   : > { %v375_v19 = vpop.eup %374 }
 0x152   : > { %v185_v20 = vmul.f32 0.6931472, %v375_v19 }
 0x154   : > { %v186_v21 = vadd.f32 %v185_v20, %v169_v4 }
 0x156   : > { %v187_v22 = vsub.f32 %v186_v21, %v183_v17 }
 0x158   : > { %v197_v25 = vsel %vm196_vm9, %v187_v22, 0.0 }
 0x159   : > { %v199_v26 = vsel %vm198_vm10, %v197_v25, 0.0 }
 0x15a   : > { %200 = vadd.xlane.f32.xlu1 %v199_v26 }
 0x15e   : > { %211 = vadd.xlane.f32.xlu1 %v210_v28 }
 0x1e7   : > { %v201_v29 = vpop.xlane.xlu1 %200 }
 0x1e8   : > { %v202_v30 = vrot.slane %v201_v29, 4 }
 0x1ea   : > { %v203_v31 = vadd.f32 %v202_v30, %v201_v29 }
 0x1eb   : > { %v212_v32 = vpop.xlane.xlu1 %211 }
 0x1ec   : > { %v204_v33 = vrot.slane %v203_v31, 2  ;;  %v213_v34 = vrot.slane %v212_v32, 4 }
 0x1ee   : > { %v214_v35 = vadd.f32 %v213_v34, %v212_v32  ;;  %v205_v36 = vadd.f32 %v204_v33, %v203_v31 }
 0x1f0   : > { %v215_v37 = vrot.slane %v214_v35, 2  ;;  %v206_v38 = vrot.slane %v205_v36, 1 }
 0x1f2   : > { %v216_v39 = vadd.f32 %v215_v37, %v214_v35  ;;  %v207_v40 = vadd.f32 %v206_v38, %v205_v36 }
 0x1f4   : > { %326 = vpush %v207_v40  ;;  %v217_v41 = vrot.slane %v216_v39, 1 }
 0x1f6   : > { %v218_v42 = vadd.f32 %v217_v41, %v216_v39 }
 0x1f8   : > { %328 = vpush %v218_v42 }
 0x225   : > { %s327_s4 = spop %326 }
 0x226   : > { %v221_v43 = vstv %s327_s4 }
 0x227   : > { %v222_v45 = vsel %vm220_vm11, %v221_v43, 0.0 }
 0x229   : > { %s329_s6 = spop %328 }
 0x22a   : > { %v224_v44 = vstv %s329_s6 }
 0x22b   : > { %v225_v46 = vsel %vm223_vm12, %v224_v44, 0.0 }
 0x22c   : > { %v226_v47 = vadd.f32 %v225_v46, %v222_v45 }
 0x22e   : > { %227 = vst [vmem:[%s147_s7] sm:$0xff] %v226_v47 }
 0x22f   : > { %389 = shalt.err (!%p386_p3)
}
 0x230   : > { %s390_s25 = scalar_lea.hbm %s523_s17, 128  ;;  %s394_s28 = scalar_lea.hbm %s567_s2, 256 }
 0x231   : > { %p391_p4 = scmp.ne.s32.totalorder %s523_s17, %s390_s25  ;;  %p395_p9 = scmp.lt.u32.totalorder %s523_s17, %s567_s2 }
 0x232   : > { %p396_p10 = scmp.lt.u32.totalorder %s394_s28, %s390_s25  ;;  %p398_p12 = scmp.lt.u32.totalorder %s390_s25, %s523_s17 }
 0x233   : > { %p392_p7 = pnand %p391_p4, %p496_p5 }
 0x234   : > { %p397_p11 = por %p396_p10, %p395_p9 }
 0x235   : > { %p393_p8 = pneg %p392_p7 }
 0x236   : > { %p399_p13 = por %p398_p12, %p397_p11 }
 0x238   : > { %p400_p0 = pnand %p399_p13, %p393_p8 }
 0x23a   : > { %403 = shalt.err (!%p400_p0)
}
 0x23b   : > { %330 = dma.vmem_to_hbm [thread:$0]  (%p496_p5), %s525_s8, 128, %s523_s17, %s229_s21  }
 0x23c PF: > { %p336_p1 = scmp.ge.s32.totalorder %s438_s12, 2  ;;  %s254_s3 = sand.u32 1, %s426_s9  }
 0x23d   : > { %s255_s4 = scalar_lea.sflag [#allocation3], %s254_s3 }
 0x23e   : > { %p333_p2 = pnand %p336_p1, %p500_p6 }
 0x240   : > { %421 = dma.done.wait (!%p333_p2), %s255_s4, 128  }
 0x241   : > { %423 = vsyncadd (!%p333_p2), %s255_s4, 4294967168  ;;  %p12_p3 = scmp.ge.s32.totalorder %s483_s15, 4   ;;  %s570_s9 = smov %s430_s10 }
 0x242   : > { %s571_s10 = smov %s434_s11  ;;  %s572_s11 = smov %s494_s18 }
 0x243   : > { %s573_s12 = smov %s483_s15  ;;  %14 = sbr.rel (!%p12_p3) target bundleno = 3 (0x3), region = 66 }
 0x24a   :  { %260 = vsyncpa [#allocation3], 1 }
 0x24b   :  { %262 = vsyncpa [#allocation3 + $0x1], 1 }

</bundles_post_ra>
